<compile_context>
chip_gen: v7x
topology: tpu7x:2x2x1
jax: 0.10.0
libtpu: 0.0.40
codegen_flags: <defaults>
</compile_context>

<pallas_src>
import functools

import jax
import jax.numpy as jnp
import numpy as np
from jax import lax
from jax.experimental import pallas as pl
from jax.experimental.pallas import tpu as pltpu


# ----------------------------------------------------------------------------
# Pallas kernel: fused sub-pixel deconv + folded BN + ReLU, interleaved output
# ----------------------------------------------------------------------------
def _make_kernel(Cin, Cout, W, Tr):
    """Kernel closure.  One grid step = one batch sample x one row tile (Tr rows).

    Refs:
      x_ref   : (1, Cin, Tr*2W)     column-duplicated input rows [t*Tr,(t+1)*Tr)
      halo_ref: (1, 1, Cin, 2W)     column-duplicated input row (t+1)*Tr (zeroed
                                    in the wrapper when it falls outside H)
      w_ref   : (4*Cout, 4*Cin)     parity-grouped 3x3 taps, BN scale folded in
      b_ref   : (Cout, 1)           folded BN bias
      o_ref   : (1, Cout, 2*Tr*2W)  output rows [2*t*Tr, 2*(t+1)*Tr) in final
                                    NCHW element order (flattened rows*cols)
    """
    two_w = 2 * W
    Lt = Tr * two_w

    def kernel(x_ref, halo_ref, w_ref, b_ref, o_ref):
        x = x_ref[0]                   # (Cin, Lt), lane l = m*2W + col, value x[., m, col//2]
        halo = halo_ref[0, 0]          # (Cin, 2W)

        lane = lax.broadcasted_iota(jnp.int32, (1, Lt), 1)
        col = lane % two_w             # output column within a row
        dx_mask = col >= (two_w - 2)   # taps that would read (zero-padded) input col W
        col_even = (col % 2) == 0      # output column parity px

        zeros2 = jnp.zeros((x.shape[0], 2), x.dtype)

        # Four tap-shifted copies of the duplicated input (dy, dx in {0,1}):
        #   value needed at lane l for shift (dy,dx) is x[., m+dy, col//2 + dx].
        x00 = x
        x01 = jnp.where(dx_mask, 0.0,
                        jnp.concatenate([x[:, 2:], zeros2], axis=1))
        if Tr > 1:
            x10 = jnp.concatenate([x[:, two_w:], halo], axis=1)
        else:
            x10 = halo
        x11 = jnp.where(dx_mask, 0.0,
                        jnp.concatenate([x10[:, 2:], zeros2], axis=1))
        xs = jnp.concatenate([x00, x01, x10, x11], axis=0)          # (4*Cin, Lt)

        # One fused MXU contraction for all 9 taps and all 4 output parities.
        y = jnp.dot(w_ref[...], xs,
                    preferred_element_type=jnp.float32)             # (4*Cout, Lt)

        b = b_ref[...]                                              # (Cout, 1)
        for py in range(2):                                         # output row parity
            ev = y[(2 * py) * Cout:(2 * py + 1) * Cout, :]          # px = 0 group
            od = y[(2 * py + 1) * Cout:(2 * py + 2) * Cout, :]      # px = 1 group
            plane = jnp.where(col_even, ev, od) + b                 # columns interleaved
            plane = jnp.maximum(plane, 0.0).astype(o_ref.dtype)     # (Cout, Lt)
            # Scatter each input-row chunk to its (already column-interleaved)
            # output row: local output row 2*i + py lives at lane offset
            # (2*i+py)*2W of the flattened output block.
            for i in range(Tr):
                dst = (2 * i + py) * two_w
                o_ref[0, :, dst:dst + two_w] = plane[:, i * two_w:(i + 1) * two_w]

    return kernel


# ----------------------------------------------------------------------------
# Wrapper: parameter plumbing + pallas_call
# ----------------------------------------------------------------------------
def _build_wbig(w):
    """w: (Cin, Cout, 3, 3) PyTorch ConvTranspose2d layout -> (4*Cout, 4*Cin).

    Row block g = py*2+px (output parity), col block s = dy*2+dx (input shift).
    Tap (ky, kx) = (py - 2*dy + 1, px - 2*dx + 1); invalid taps are zero.
    """
    Cin, Cout = w.shape[0], w.shape[1]
    rows = []
    for py in range(2):
        for px in range(2):
            blocks = []
            for dy in range(2):
                for dx in range(2):
                    ky, kx = py - 2 * dy + 1, px - 2 * dx + 1
                    if 0 <= ky < 3 and 0 <= kx < 3:
                        blocks.append(w[:, :, ky, kx].T)             # (Cout, Cin)
                    else:
                        blocks.append(jnp.zeros((Cout, Cin), w.dtype))
            rows.append(jnp.concatenate(blocks, axis=1))             # (Cout, 4*Cin)
    return jnp.concatenate(rows, axis=0)                             # (4*Cout, 4*Cin)


def _pick_row_tile(N, Cin, Cout, H, W, itemsize=4, vmem_budget=16 << 20,
                   min_steps=2):
    """Largest row tile that keeps lane blocks 128-aligned (or full) and fits a
    conservative VMEM budget (v7x-safe); guarantees >=min_steps grid steps."""
    two_w = 2 * W

    def fits(tr):
        lt = tr * two_w
        need = itemsize * lt * (2 * Cin          # double-buffered input block
                                + 4 * Cout       # double-buffered output block
                                + 4 * Cin        # shifted stack
                                + 5 * Cout)      # matmul result + plane temps
        return need <= vmem_budget

    divisors = [d for d in range(1, H + 1) if H % d == 0]
    aligned = [d for d in divisors
               if (d == H or (d * two_w) % 128 == 0) and (d > 1 or H == 1)]
    cands = [d for d in aligned if fits(d)] or aligned or divisors
    tr = max(cands)
    while N * (H // tr) < min_steps:              # keep both v7x cores busy
        smaller = [d for d in cands if d < tr]
        if not smaller:
            break
        tr = max(smaller)
    return tr


def deconv_bn_relu(x, w, gamma, beta, mean, var, eps=1e-5, row_tile=None,
                   compute_dtype=jnp.float32):
    """basic_deconv_up forward (eval-mode BN).  x: (N, Cin, H, W) f32,
    w: (Cin, Cout, 3, 3) PyTorch ConvTranspose2d layout.
    Returns (N, Cout, 2H, 2W) f32."""
    N, Cin, H, W = x.shape
    Cout = w.shape[1]
    two_w = 2 * W

    Tr = row_tile if row_tile is not None else _pick_row_tile(N, Cin, Cout, H, W)
    assert H % Tr == 0, "row_tile must divide H"
    n_tiles = H // Tr
    Lt = Tr * two_w

    # ---- wrapper-side plumbing (cheap, done once) ---------------------------
    # Column-duplicated input: xd4[n,k,m,2j] = xd4[n,k,m,2j+1] = x[n,k,m,j].
    # This is the only wrapper data-movement pass (2x input bytes, input is the
    # small side); everything else (tap shifts, BN, output pixel interleave)
    # happens inside the kernel.
    x_c = x.astype(compute_dtype)
    xd4 = jnp.repeat(x_c, 2, axis=3)                       # (N, Cin, H, 2W)
    xd = xd4.reshape(N, Cin, H * two_w)                    # free reshape

    # One duplicated halo row per row-tile (row (t+1)*Tr), zeroed past the edge.
    halo_rows = jnp.minimum((jnp.arange(n_tiles) + 1) * Tr, H - 1)
    halo = jnp.transpose(xd4[:, :, halo_rows, :], (0, 2, 1, 3))  # (N, n_tiles, Cin, 2W)
    valid = ((jnp.arange(n_tiles) + 1) * Tr < H).astype(halo.dtype)
    halo = halo * valid[None, :, None, None]

    # Fold BN (eval) scale into the weights; bias stays as a tiny operand.
    scale = gamma * lax.rsqrt(var + eps)
    bias = beta - mean * scale
    w_big = (_build_wbig(w) * jnp.tile(scale, 4)[:, None]).astype(compute_dtype)
    b2d = bias[:, None].astype(jnp.float32)                # (Cout, 1)

    kernel = _make_kernel(Cin, Cout, W, Tr)

    flops = 2 * N * n_tiles * (4 * Cout) * (4 * Cin) * Lt
    bytes_accessed = ((xd.size + halo.size + w_big.size) * xd.dtype.itemsize
                      + (N * Cout * 4 * H * W + b2d.size) * 4)

    out_flat = pl.pallas_call(
        kernel,
        out_shape=jax.ShapeDtypeStruct((N, Cout, 4 * H * W), jnp.float32),
        grid=(N, n_tiles),
        in_specs=[
            pl.BlockSpec((1, Cin, Lt), lambda n, t: (n, 0, t)),
            pl.BlockSpec((1, 1, Cin, two_w), lambda n, t: (n, t, 0, 0)),
            pl.BlockSpec((4 * Cout, 4 * Cin), lambda n, t: (0, 0)),
            pl.BlockSpec((Cout, 1), lambda n, t: (0, 0)),
        ],
        out_specs=pl.BlockSpec((1, Cout, 2 * Lt), lambda n, t: (n, 0, t)),
        compiler_params=pltpu.CompilerParams(
            dimension_semantics=("parallel", "parallel")),
        cost_estimate=pl.CostEstimate(flops=flops, transcendentals=0,
                                      bytes_accessed=bytes_accessed),
    )(xd, halo, w_big, b2d)

    # Element order is already NCHW (n, c, 2m+py, 2j+px): free reshape only.
    return out_flat.reshape(N, Cout, 2 * H, 2 * W)


# ----------------------------------------------------------------------------
# Pure-JAX reference (correctness check only)
# ----------------------------------------------------------------------------
def _ref_forward(x, w, gamma, beta, mean, var, eps=1e-5):
    # ConvTranspose2d(k=3, s=2, p=1, op=1) == conv with lhs_dilation=2,
    # padding (k-1-p, k-1-p+op) = (1, 2) and the flipped, channel-swapped kernel.
    w_f = jnp.transpose(w[:, :, ::-1, ::-1], (1, 0, 2, 3))          # (Cout,Cin,3,3)
    y = jax.lax.conv_general_dilated(
        x, w_f, window_strides=(1, 1), padding=((1, 2), (1, 2)),
        lhs_dilation=(2, 2), dimension_numbers=("NCHW", "OIHW", "NCHW"),
        precision=jax.lax.Precision.HIGHEST)
    scale = gamma * jax.lax.rsqrt(var + eps)
    bias = beta - mean * scale
    y = y * scale[None, :, None, None] + bias[None, :, None, None]
    return jnp.maximum(y, 0.0)


# ----------------------------------------------------------------------------
if __name__ == "__main__":
    key = jax.random.PRNGKey(0)
    N, Cin, H, W = 2, 4, 16, 16
    Cout = 8   # basic_deconv_up(in_channel=4, out_channel=8)

    kx, kw, kg, kb, km, kv = jax.random.split(key, 6)
    x = jax.random.normal(kx, (N, Cin, H, W), jnp.float32)
    # PyTorch ConvTranspose2d weight layout: (in_channels, out_channels, kH, kW)
    w = jax.random.normal(kw, (Cin, Cout, 3, 3), jnp.float32) / np.sqrt(Cin * 9)
    gamma = 1.0 + 0.1 * jax.random.normal(kg, (Cout,), jnp.float32)
    beta = 0.1 * jax.random.normal(kb, (Cout,), jnp.float32)
    mean = 0.1 * jax.random.normal(km, (Cout,), jnp.float32)
    var = 1.0 + 0.1 * jnp.abs(jax.random.normal(kv, (Cout,), jnp.float32))

    ref = _ref_forward(x, w, gamma, beta, mean, var)

    # Default tiling (whole-height tile, halo masked).
    fwd = jax.jit(deconv_bn_relu)
    out = jax.block_until_ready(fwd(x, w, gamma, beta, mean, var))
    np.testing.assert_allclose(np.asarray(out), np.asarray(ref),
                               rtol=1e-4, atol=1e-4)
    assert out.shape == (N, Cout, 2 * H, 2 * W)

    # Row-tiled variant (exercises the real halo path).
    fwd_tiled = jax.jit(functools.partial(deconv_bn_relu, row_tile=4))
    out2 = jax.block_until_ready(fwd_tiled(x, w, gamma, beta, mean, var))
    np.testing.assert_allclose(np.asarray(out2), np.asarray(ref),
                               rtol=1e-4, atol=1e-4)

    print("KERNEL_OK")
</pallas_src>

<mosaic_0001>
module attributes {stable_mosaic.version = 11 : i64} {
  func.func @kernel(%arg0: i32, %arg1: i32, %arg2: memref<1x4x512xf32, #tpu.memory_space<vmem>>, %arg3: memref<1x1x4x32xf32, #tpu.memory_space<vmem>>, %arg4: memref<32x16xf32, #tpu.memory_space<vmem>>, %arg5: memref<8x1xf32, #tpu.memory_space<vmem>>, %arg6: memref<1x8x1024xf32, #tpu.memory_space<vmem>>) attributes {dimension_semantics = [#tpu.dimension_semantics<parallel>, #tpu.dimension_semantics<parallel>], iteration_bounds = array<i64: 2, 1>, scalar_prefetch = 0 : i64, scratch_operands = 0 : i64, tpu.core_type = #tpu.core_type<tc>, window_params = [{transform_indices = @transform_0, window_bounds = array<i64: 1, 4, 512>}, {transform_indices = @transform_1, window_bounds = array<i64: 1, 1, 4, 32>}, {pipeline_mode = #tpu.pipeline_mode<synchronous>, transform_indices = @transform_2, window_bounds = array<i64: 32, 16>}, {pipeline_mode = #tpu.pipeline_mode<synchronous>, transform_indices = @transform_3, window_bounds = array<i64: 8, 1>}, {transform_indices = @transform_4, window_bounds = array<i64: 1, 8, 1024>}]} {
    %c0 = arith.constant 0 : index
    %c0_0 = arith.constant 0 : index
    %c0_1 = arith.constant 0 : index
    %0 = vector.load %arg2[%c0, %c0_0, %c0_1] : memref<1x4x512xf32, #tpu.memory_space<vmem>>, vector<1x4x512xf32>
    %1 = vector.shape_cast %0 : vector<1x4x512xf32> to vector<4x512xf32>
    %c0_2 = arith.constant 0 : index
    %c0_3 = arith.constant 0 : index
    %c0_4 = arith.constant 0 : index
    %c0_5 = arith.constant 0 : index
    %2 = vector.load %arg3[%c0_2, %c0_3, %c0_4, %c0_5] : memref<1x1x4x32xf32, #tpu.memory_space<vmem>>, vector<1x1x4x32xf32>
    %3 = vector.shape_cast %2 : vector<1x1x4x32xf32> to vector<4x32xf32>
    %4 = tpu.iota {dimensions = array<i32: 1>} : vector<1x512xi32>
    %c32_i32 = arith.constant 32 : i32
    %c0_i32 = arith.constant 0 : i32
    %5 = arith.cmpi eq, %c32_i32, %c0_i32 : i32
    %c1_i32 = arith.constant 1 : i32
    %6 = arith.select %5, %c1_i32, %c32_i32 : i32
    %7 = vector.broadcast %6 : i32 to vector<1x512xi32>
    %8 = arith.remsi %4, %7 : vector<1x512xi32>
    %c0_i32_6 = arith.constant 0 : i32
    %9 = vector.broadcast %c0_i32_6 : i32 to vector<1x512xi32>
    %10 = arith.cmpi ne, %8, %9 : vector<1x512xi32>
    %c0_i32_7 = arith.constant 0 : i32
    %11 = vector.broadcast %c0_i32_7 : i32 to vector<1x512xi32>
    %12 = arith.cmpi slt, %8, %11 : vector<1x512xi32>
    %c0_i32_8 = arith.constant 0 : i32
    %13 = arith.cmpi slt, %6, %c0_i32_8 : i32
    %14 = vector.broadcast %13 : i1 to vector<1x512xi1>
    %15 = vector.broadcast %14 : vector<1x512xi1> to vector<1x512xi1>
    %16 = arith.xori %12, %15 : vector<1x512xi1>
    %17 = arith.andi %16, %10 : vector<1x512xi1>
    %18 = vector.broadcast %6 : i32 to vector<1x512xi32>
    %19 = arith.addi %8, %18 : vector<1x512xi32>
    %20 = arith.select %17, %19, %8 : vector<1x512xi1>, vector<1x512xi32>
    %c30_i32 = arith.constant 30 : i32
    %21 = vector.broadcast %c30_i32 : i32 to vector<1x512xi32>
    %22 = arith.cmpi sge, %20, %21 : vector<1x512xi32>
    %c2_i32 = arith.constant 2 : i32
    %c0_i32_9 = arith.constant 0 : i32
    %23 = arith.cmpi eq, %c2_i32, %c0_i32_9 : i32
    %c1_i32_10 = arith.constant 1 : i32
    %24 = arith.select %23, %c1_i32_10, %c2_i32 : i32
    %25 = vector.broadcast %24 : i32 to vector<1x512xi32>
    %26 = arith.remsi %20, %25 : vector<1x512xi32>
    %c0_i32_11 = arith.constant 0 : i32
    %27 = vector.broadcast %c0_i32_11 : i32 to vector<1x512xi32>
    %28 = arith.cmpi ne, %26, %27 : vector<1x512xi32>
    %c0_i32_12 = arith.constant 0 : i32
    %29 = vector.broadcast %c0_i32_12 : i32 to vector<1x512xi32>
    %30 = arith.cmpi slt, %26, %29 : vector<1x512xi32>
    %c0_i32_13 = arith.constant 0 : i32
    %31 = arith.cmpi slt, %24, %c0_i32_13 : i32
    %32 = vector.broadcast %31 : i1 to vector<1x512xi1>
    %33 = vector.broadcast %32 : vector<1x512xi1> to vector<1x512xi1>
    %34 = arith.xori %30, %33 : vector<1x512xi1>
    %35 = arith.andi %34, %28 : vector<1x512xi1>
    %36 = vector.broadcast %24 : i32 to vector<1x512xi32>
    %37 = arith.addi %26, %36 : vector<1x512xi32>
    %38 = arith.select %35, %37, %26 : vector<1x512xi1>, vector<1x512xi32>
    %c0_i32_14 = arith.constant 0 : i32
    %39 = vector.broadcast %c0_i32_14 : i32 to vector<1x512xi32>
    %40 = arith.cmpi eq, %38, %39 : vector<1x512xi32>
    %cst = arith.constant 0.000000e+00 : f32
    %41 = vector.broadcast %cst : f32 to vector<4x2xf32>
    %42 = vector.extract_strided_slice %1 {offsets = [0, 2], sizes = [4, 510], strides = [1, 1]} : vector<4x512xf32> to vector<4x510xf32>
    %43 = tpu.concatenate %42, %41 in 1 : vector<4x510xf32>, vector<4x2xf32> -> vector<4x512xf32>
    %cst_15 = arith.constant 0.000000e+00 : f32
    %44 = vector.shape_cast %22 : vector<1x512xi1> to vector<1x512xi1>
    %45 = vector.broadcast %44 : vector<1x512xi1> to vector<4x512xi1>
    %46 = vector.broadcast %cst_15 : f32 to vector<4x512xf32>
    %47 = arith.select %45, %46, %43 : vector<4x512xi1>, vector<4x512xf32>
    %48 = vector.extract_strided_slice %1 {offsets = [0, 32], sizes = [4, 480], strides = [1, 1]} : vector<4x512xf32> to vector<4x480xf32>
    %49 = tpu.concatenate %48, %3 in 1 : vector<4x480xf32>, vector<4x32xf32> -> vector<4x512xf32>
    %50 = vector.extract_strided_slice %49 {offsets = [0, 2], sizes = [4, 510], strides = [1, 1]} : vector<4x512xf32> to vector<4x510xf32>
    %51 = tpu.concatenate %50, %41 in 1 : vector<4x510xf32>, vector<4x2xf32> -> vector<4x512xf32>
    %cst_16 = arith.constant 0.000000e+00 : f32
    %52 = vector.shape_cast %22 : vector<1x512xi1> to vector<1x512xi1>
    %53 = vector.broadcast %52 : vector<1x512xi1> to vector<4x512xi1>
    %54 = vector.broadcast %cst_16 : f32 to vector<4x512xf32>
    %55 = arith.select %53, %54, %51 : vector<4x512xi1>, vector<4x512xf32>
    %56 = tpu.concatenate %1, %47, %49, %55 in 0 : vector<4x512xf32>, vector<4x512xf32>, vector<4x512xf32>, vector<4x512xf32> -> vector<16x512xf32>
    %c0_17 = arith.constant 0 : index
    %c0_18 = arith.constant 0 : index
    %57 = vector.load %arg4[%c0_17, %c0_18] : memref<32x16xf32, #tpu.memory_space<vmem>>, vector<32x16xf32>
    %cst_19 = arith.constant dense<0.000000e+00> : vector<32x512xf32>
    %58 = tpu.matmul %57, %56, %cst_19 {dimension_numbers = #tpu.dot_dimension_numbers<[1], [0], [0], [1], [0, 0, 1, 1], [], []>} : vector<32x16xf32>, vector<16x512xf32>, vector<32x512xf32> -> vector<32x512xf32>
    %c0_20 = arith.constant 0 : index
    %c0_21 = arith.constant 0 : index
    %59 = vector.load %arg5[%c0_20, %c0_21] : memref<8x1xf32, #tpu.memory_space<vmem>>, vector<8x1xf32>
    %60 = vector.extract_strided_slice %58 {offsets = [0, 0], sizes = [8, 512], strides = [1, 1]} : vector<32x512xf32> to vector<8x512xf32>
    %61 = vector.extract_strided_slice %58 {offsets = [8, 0], sizes = [8, 512], strides = [1, 1]} : vector<32x512xf32> to vector<8x512xf32>
    %62 = vector.shape_cast %40 : vector<1x512xi1> to vector<1x512xi1>
    %63 = vector.broadcast %62 : vector<1x512xi1> to vector<8x512xi1>
    %64 = arith.select %63, %60, %61 : vector<8x512xi1>, vector<8x512xf32>
    %65 = vector.broadcast %59 : vector<8x1xf32> to vector<8x512xf32>
    %66 = arith.addf %64, %65 : vector<8x512xf32>
    %cst_22 = arith.constant 0.000000e+00 : f32
    %67 = vector.broadcast %cst_22 : f32 to vector<8x512xf32>
    %68 = arith.maximumf %66, %67 : vector<8x512xf32>
    %69 = vector.extract_strided_slice %68 {offsets = [0, 0], sizes = [8, 32], strides = [1, 1]} : vector<8x512xf32> to vector<8x32xf32>
    %c0_23 = arith.constant 0 : index
    %c0_24 = arith.constant 0 : index
    %c0_25 = arith.constant 0 : index
    %70 = vector.load %arg6[%c0_23, %c0_24, %c0_25] : memref<1x8x1024xf32, #tpu.memory_space<vmem>>, vector<1x8x32xf32>
    %71 = vector.shape_cast %70 : vector<1x8x32xf32> to vector<8x32xf32>
    %72 = vector.shape_cast %69 : vector<8x32xf32> to vector<1x8x32xf32>
    tpu.vector_store %arg6[%c0_23, %c0_24, %c0_25], %72 {strides = array<i32>} : memref<1x8x1024xf32, #tpu.memory_space<vmem>>, vector<1x8x32xf32>,
    %73 = vector.extract_strided_slice %68 {offsets = [0, 32], sizes = [8, 32], strides = [1, 1]} : vector<8x512xf32> to vector<8x32xf32>
    %c0_26 = arith.constant 0 : index
    %c0_27 = arith.constant 0 : index
    %c64 = arith.constant 64 : index
    %74 = vector.load %arg6[%c0_26, %c0_27, %c64] : memref<1x8x1024xf32, #tpu.memory_space<vmem>>, vector<1x8x32xf32>
    %75 = vector.shape_cast %74 : vector<1x8x32xf32> to vector<8x32xf32>
    %76 = vector.shape_cast %73 : vector<8x32xf32> to vector<1x8x32xf32>
    tpu.vector_store %arg6[%c0_26, %c0_27, %c64], %76 {strides = array<i32>} : memref<1x8x1024xf32, #tpu.memory_space<vmem>>, vector<1x8x32xf32>,
    %77 = vector.extract_strided_slice %68 {offsets = [0, 64], sizes = [8, 32], strides = [1, 1]} : vector<8x512xf32> to vector<8x32xf32>
    %c0_28 = arith.constant 0 : index
    %c0_29 = arith.constant 0 : index
    %c128 = arith.constant 128 : index
    %78 = vector.load %arg6[%c0_28, %c0_29, %c128] : memref<1x8x1024xf32, #tpu.memory_space<vmem>>, vector<1x8x32xf32>
    %79 = vector.shape_cast %78 : vector<1x8x32xf32> to vector<8x32xf32>
    %80 = vector.shape_cast %77 : vector<8x32xf32> to vector<1x8x32xf32>
    tpu.vector_store %arg6[%c0_28, %c0_29, %c128], %80 {strides = array<i32>} : memref<1x8x1024xf32, #tpu.memory_space<vmem>>, vector<1x8x32xf32>,
    %81 = vector.extract_strided_slice %68 {offsets = [0, 96], sizes = [8, 32], strides = [1, 1]} : vector<8x512xf32> to vector<8x32xf32>
    %c0_30 = arith.constant 0 : index
    %c0_31 = arith.constant 0 : index
    %c192 = arith.constant 192 : index
    %82 = vector.load %arg6[%c0_30, %c0_31, %c192] : memref<1x8x1024xf32, #tpu.memory_space<vmem>>, vector<1x8x32xf32>
    %83 = vector.shape_cast %82 : vector<1x8x32xf32> to vector<8x32xf32>
    %84 = vector.shape_cast %81 : vector<8x32xf32> to vector<1x8x32xf32>
    tpu.vector_store %arg6[%c0_30, %c0_31, %c192], %84 {strides = array<i32>} : memref<1x8x1024xf32, #tpu.memory_space<vmem>>, vector<1x8x32xf32>,
    %85 = vector.extract_strided_slice %68 {offsets = [0, 128], sizes = [8, 32], strides = [1, 1]} : vector<8x512xf32> to vector<8x32xf32>
    %c0_32 = arith.constant 0 : index
    %c0_33 = arith.constant 0 : index
    %c256 = arith.constant 256 : index
    %86 = vector.load %arg6[%c0_32, %c0_33, %c256] : memref<1x8x1024xf32, #tpu.memory_space<vmem>>, vector<1x8x32xf32>
    %87 = vector.shape_cast %86 : vector<1x8x32xf32> to vector<8x32xf32>
    %88 = vector.shape_cast %85 : vector<8x32xf32> to vector<1x8x32xf32>
    tpu.vector_store %arg6[%c0_32, %c0_33, %c256], %88 {strides = array<i32>} : memref<1x8x1024xf32, #tpu.memory_space<vmem>>, vector<1x8x32xf32>,
    %89 = vector.extract_strided_slice %68 {offsets = [0, 160], sizes = [8, 32], strides = [1, 1]} : vector<8x512xf32> to vector<8x32xf32>
    %c0_34 = arith.constant 0 : index
    %c0_35 = arith.constant 0 : index
    %c320 = arith.constant 320 : index
    %90 = vector.load %arg6[%c0_34, %c0_35, %c320] : memref<1x8x1024xf32, #tpu.memory_space<vmem>>, vector<1x8x32xf32>
    %91 = vector.shape_cast %90 : vector<1x8x32xf32> to vector<8x32xf32>
    %92 = vector.shape_cast %89 : vector<8x32xf32> to vector<1x8x32xf32>
    tpu.vector_store %arg6[%c0_34, %c0_35, %c320], %92 {strides = array<i32>} : memref<1x8x1024xf32, #tpu.memory_space<vmem>>, vector<1x8x32xf32>,
    %93 = vector.extract_strided_slice %68 {offsets = [0, 192], sizes = [8, 32], strides = [1, 1]} : vector<8x512xf32> to vector<8x32xf32>
    %c0_36 = arith.constant 0 : index
    %c0_37 = arith.constant 0 : index
    %c384 = arith.constant 384 : index
    %94 = vector.load %arg6[%c0_36, %c0_37, %c384] : memref<1x8x1024xf32, #tpu.memory_space<vmem>>, vector<1x8x32xf32>
    %95 = vector.shape_cast %94 : vector<1x8x32xf32> to vector<8x32xf32>
    %96 = vector.shape_cast %93 : vector<8x32xf32> to vector<1x8x32xf32>
    tpu.vector_store %arg6[%c0_36, %c0_37, %c384], %96 {strides = array<i32>} : memref<1x8x1024xf32, #tpu.memory_space<vmem>>, vector<1x8x32xf32>,
    %97 = vector.extract_strided_slice %68 {offsets = [0, 224], sizes = [8, 32], strides = [1, 1]} : vector<8x512xf32> to vector<8x32xf32>
    %c0_38 = arith.constant 0 : index
    %c0_39 = arith.constant 0 : index
    %c448 = arith.constant 448 : index
    %98 = vector.load %arg6[%c0_38, %c0_39, %c448] : memref<1x8x1024xf32, #tpu.memory_space<vmem>>, vector<1x8x32xf32>
    %99 = vector.shape_cast %98 : vector<1x8x32xf32> to vector<8x32xf32>
    %100 = vector.shape_cast %97 : vector<8x32xf32> to vector<1x8x32xf32>
    tpu.vector_store %arg6[%c0_38, %c0_39, %c448], %100 {strides = array<i32>} : memref<1x8x1024xf32, #tpu.memory_space<vmem>>, vector<1x8x32xf32>,
    %101 = vector.extract_strided_slice %68 {offsets = [0, 256], sizes = [8, 32], strides = [1, 1]} : vector<8x512xf32> to vector<8x32xf32>
    %c0_40 = arith.constant 0 : index
    %c0_41 = arith.constant 0 : index
    %c512 = arith.constant 512 : index
    %102 = vector.load %arg6[%c0_40, %c0_41, %c512] : memref<1x8x1024xf32, #tpu.memory_space<vmem>>, vector<1x8x32xf32>
    %103 = vector.shape_cast %102 : vector<1x8x32xf32> to vector<8x32xf32>
    %104 = vector.shape_cast %101 : vector<8x32xf32> to vector<1x8x32xf32>
    tpu.vector_store %arg6[%c0_40, %c0_41, %c512], %104 {strides = array<i32>} : memref<1x8x1024xf32, #tpu.memory_space<vmem>>, vector<1x8x32xf32>,
    %105 = vector.extract_strided_slice %68 {offsets = [0, 288], sizes = [8, 32], strides = [1, 1]} : vector<8x512xf32> to vector<8x32xf32>
    %c0_42 = arith.constant 0 : index
    %c0_43 = arith.constant 0 : index
    %c576 = arith.constant 576 : index
    %106 = vector.load %arg6[%c0_42, %c0_43, %c576] : memref<1x8x1024xf32, #tpu.memory_space<vmem>>, vector<1x8x32xf32>
    %107 = vector.shape_cast %106 : vector<1x8x32xf32> to vector<8x32xf32>
    %108 = vector.shape_cast %105 : vector<8x32xf32> to vector<1x8x32xf32>
    tpu.vector_store %arg6[%c0_42, %c0_43, %c576], %108 {strides = array<i32>} : memref<1x8x1024xf32, #tpu.memory_space<vmem>>, vector<1x8x32xf32>,
    %109 = vector.extract_strided_slice %68 {offsets = [0, 320], sizes = [8, 32], strides = [1, 1]} : vector<8x512xf32> to vector<8x32xf32>
    %c0_44 = arith.constant 0 : index
    %c0_45 = arith.constant 0 : index
    %c640 = arith.constant 640 : index
    %110 = vector.load %arg6[%c0_44, %c0_45, %c640] : memref<1x8x1024xf32, #tpu.memory_space<vmem>>, vector<1x8x32xf32>
    %111 = vector.shape_cast %110 : vector<1x8x32xf32> to vector<8x32xf32>
    %112 = vector.shape_cast %109 : vector<8x32xf32> to vector<1x8x32xf32>
    tpu.vector_store %arg6[%c0_44, %c0_45, %c640], %112 {strides = array<i32>} : memref<1x8x1024xf32, #tpu.memory_space<vmem>>, vector<1x8x32xf32>,
    %113 = vector.extract_strided_slice %68 {offsets = [0, 352], sizes = [8, 32], strides = [1, 1]} : vector<8x512xf32> to vector<8x32xf32>
    %c0_46 = arith.constant 0 : index
    %c0_47 = arith.constant 0 : index
    %c704 = arith.constant 704 : index
    %114 = vector.load %arg6[%c0_46, %c0_47, %c704] : memref<1x8x1024xf32, #tpu.memory_space<vmem>>, vector<1x8x32xf32>
    %115 = vector.shape_cast %114 : vector<1x8x32xf32> to vector<8x32xf32>
    %116 = vector.shape_cast %113 : vector<8x32xf32> to vector<1x8x32xf32>
    tpu.vector_store %arg6[%c0_46, %c0_47, %c704], %116 {strides = array<i32>} : memref<1x8x1024xf32, #tpu.memory_space<vmem>>, vector<1x8x32xf32>,
    %117 = vector.extract_strided_slice %68 {offsets = [0, 384], sizes = [8, 32], strides = [1, 1]} : vector<8x512xf32> to vector<8x32xf32>
    %c0_48 = arith.constant 0 : index
    %c0_49 = arith.constant 0 : index
    %c768 = arith.constant 768 : index
    %118 = vector.load %arg6[%c0_48, %c0_49, %c768] : memref<1x8x1024xf32, #tpu.memory_space<vmem>>, vector<1x8x32xf32>
    %119 = vector.shape_cast %118 : vector<1x8x32xf32> to vector<8x32xf32>
    %120 = vector.shape_cast %117 : vector<8x32xf32> to vector<1x8x32xf32>
    tpu.vector_store %arg6[%c0_48, %c0_49, %c768], %120 {strides = array<i32>} : memref<1x8x1024xf32, #tpu.memory_space<vmem>>, vector<1x8x32xf32>,
    %121 = vector.extract_strided_slice %68 {offsets = [0, 416], sizes = [8, 32], strides = [1, 1]} : vector<8x512xf32> to vector<8x32xf32>
    %c0_50 = arith.constant 0 : index
    %c0_51 = arith.constant 0 : index
    %c832 = arith.constant 832 : index
    %122 = vector.load %arg6[%c0_50, %c0_51, %c832] : memref<1x8x1024xf32, #tpu.memory_space<vmem>>, vector<1x8x32xf32>
    %123 = vector.shape_cast %122 : vector<1x8x32xf32> to vector<8x32xf32>
    %124 = vector.shape_cast %121 : vector<8x32xf32> to vector<1x8x32xf32>
    tpu.vector_store %arg6[%c0_50, %c0_51, %c832], %124 {strides = array<i32>} : memref<1x8x1024xf32, #tpu.memory_space<vmem>>, vector<1x8x32xf32>,
    %125 = vector.extract_strided_slice %68 {offsets = [0, 448], sizes = [8, 32], strides = [1, 1]} : vector<8x512xf32> to vector<8x32xf32>
    %c0_52 = arith.constant 0 : index
    %c0_53 = arith.constant 0 : index
    %c896 = arith.constant 896 : index
    %126 = vector.load %arg6[%c0_52, %c0_53, %c896] : memref<1x8x1024xf32, #tpu.memory_space<vmem>>, vector<1x8x32xf32>
    %127 = vector.shape_cast %126 : vector<1x8x32xf32> to vector<8x32xf32>
    %128 = vector.shape_cast %125 : vector<8x32xf32> to vector<1x8x32xf32>
    tpu.vector_store %arg6[%c0_52, %c0_53, %c896], %128 {strides = array<i32>} : memref<1x8x1024xf32, #tpu.memory_space<vmem>>, vector<1x8x32xf32>,
    %129 = vector.extract_strided_slice %68 {offsets = [0, 480], sizes = [8, 32], strides = [1, 1]} : vector<8x512xf32> to vector<8x32xf32>
    %c0_54 = arith.constant 0 : index
    %c0_55 = arith.constant 0 : index
    %c960 = arith.constant 960 : index
    %130 = vector.load %arg6[%c0_54, %c0_55, %c960] : memref<1x8x1024xf32, #tpu.memory_space<vmem>>, vector<1x8x32xf32>
    %131 = vector.shape_cast %130 : vector<1x8x32xf32> to vector<8x32xf32>
    %132 = vector.shape_cast %129 : vector<8x32xf32> to vector<1x8x32xf32>
    tpu.vector_store %arg6[%c0_54, %c0_55, %c960], %132 {strides = array<i32>} : memref<1x8x1024xf32, #tpu.memory_space<vmem>>, vector<1x8x32xf32>,
    %133 = vector.extract_strided_slice %58 {offsets = [16, 0], sizes = [8, 512], strides = [1, 1]} : vector<32x512xf32> to vector<8x512xf32>
    %134 = vector.extract_strided_slice %58 {offsets = [24, 0], sizes = [8, 512], strides = [1, 1]} : vector<32x512xf32> to vector<8x512xf32>
    %135 = vector.shape_cast %40 : vector<1x512xi1> to vector<1x512xi1>
    %136 = vector.broadcast %135 : vector<1x512xi1> to vector<8x512xi1>
    %137 = arith.select %136, %133, %134 : vector<8x512xi1>, vector<8x512xf32>
    %138 = vector.broadcast %59 : vector<8x1xf32> to vector<8x512xf32>
    %139 = arith.addf %137, %138 : vector<8x512xf32>
    %cst_56 = arith.constant 0.000000e+00 : f32
    %140 = vector.broadcast %cst_56 : f32 to vector<8x512xf32>
    %141 = arith.maximumf %139, %140 : vector<8x512xf32>
    %142 = vector.extract_strided_slice %141 {offsets = [0, 0], sizes = [8, 32], strides = [1, 1]} : vector<8x512xf32> to vector<8x32xf32>
    %c0_57 = arith.constant 0 : index
    %c0_58 = arith.constant 0 : index
    %c32 = arith.constant 32 : index
    %143 = vector.load %arg6[%c0_57, %c0_58, %c32] : memref<1x8x1024xf32, #tpu.memory_space<vmem>>, vector<1x8x32xf32>
    %144 = vector.shape_cast %143 : vector<1x8x32xf32> to vector<8x32xf32>
    %145 = vector.shape_cast %142 : vector<8x32xf32> to vector<1x8x32xf32>
    tpu.vector_store %arg6[%c0_57, %c0_58, %c32], %145 {strides = array<i32>} : memref<1x8x1024xf32, #tpu.memory_space<vmem>>, vector<1x8x32xf32>,
    %146 = vector.extract_strided_slice %141 {offsets = [0, 32], sizes = [8, 32], strides = [1, 1]} : vector<8x512xf32> to vector<8x32xf32>
    %c0_59 = arith.constant 0 : index
    %c0_60 = arith.constant 0 : index
    %c96 = arith.constant 96 : index
    %147 = vector.load %arg6[%c0_59, %c0_60, %c96] : memref<1x8x1024xf32, #tpu.memory_space<vmem>>, vector<1x8x32xf32>
    %148 = vector.shape_cast %147 : vector<1x8x32xf32> to vector<8x32xf32>
    %149 = vector.shape_cast %146 : vector<8x32xf32> to vector<1x8x32xf32>
    tpu.vector_store %arg6[%c0_59, %c0_60, %c96], %149 {strides = array<i32>} : memref<1x8x1024xf32, #tpu.memory_space<vmem>>, vector<1x8x32xf32>,
    %150 = vector.extract_strided_slice %141 {offsets = [0, 64], sizes = [8, 32], strides = [1, 1]} : vector<8x512xf32> to vector<8x32xf32>
    %c0_61 = arith.constant 0 : index
    %c0_62 = arith.constant 0 : index
    %c160 = arith.constant 160 : index
    %151 = vector.load %arg6[%c0_61, %c0_62, %c160] : memref<1x8x1024xf32, #tpu.memory_space<vmem>>, vector<1x8x32xf32>
    %152 = vector.shape_cast %151 : vector<1x8x32xf32> to vector<8x32xf32>
    %153 = vector.shape_cast %150 : vector<8x32xf32> to vector<1x8x32xf32>
    tpu.vector_store %arg6[%c0_61, %c0_62, %c160], %153 {strides = array<i32>} : memref<1x8x1024xf32, #tpu.memory_space<vmem>>, vector<1x8x32xf32>,
    %154 = vector.extract_strided_slice %141 {offsets = [0, 96], sizes = [8, 32], strides = [1, 1]} : vector<8x512xf32> to vector<8x32xf32>
    %c0_63 = arith.constant 0 : index
    %c0_64 = arith.constant 0 : index
    %c224 = arith.constant 224 : index
    %155 = vector.load %arg6[%c0_63, %c0_64, %c224] : memref<1x8x1024xf32, #tpu.memory_space<vmem>>, vector<1x8x32xf32>
    %156 = vector.shape_cast %155 : vector<1x8x32xf32> to vector<8x32xf32>
    %157 = vector.shape_cast %154 : vector<8x32xf32> to vector<1x8x32xf32>
    tpu.vector_store %arg6[%c0_63, %c0_64, %c224], %157 {strides = array<i32>} : memref<1x8x1024xf32, #tpu.memory_space<vmem>>, vector<1x8x32xf32>,
    %158 = vector.extract_strided_slice %141 {offsets = [0, 128], sizes = [8, 32], strides = [1, 1]} : vector<8x512xf32> to vector<8x32xf32>
    %c0_65 = arith.constant 0 : index
    %c0_66 = arith.constant 0 : index
    %c288 = arith.constant 288 : index
    %159 = vector.load %arg6[%c0_65, %c0_66, %c288] : memref<1x8x1024xf32, #tpu.memory_space<vmem>>, vector<1x8x32xf32>
    %160 = vector.shape_cast %159 : vector<1x8x32xf32> to vector<8x32xf32>
    %161 = vector.shape_cast %158 : vector<8x32xf32> to vector<1x8x32xf32>
    tpu.vector_store %arg6[%c0_65, %c0_66, %c288], %161 {strides = array<i32>} : memref<1x8x1024xf32, #tpu.memory_space<vmem>>, vector<1x8x32xf32>,
    %162 = vector.extract_strided_slice %141 {offsets = [0, 160], sizes = [8, 32], strides = [1, 1]} : vector<8x512xf32> to vector<8x32xf32>
    %c0_67 = arith.constant 0 : index
    %c0_68 = arith.constant 0 : index
    %c352 = arith.constant 352 : index
    %163 = vector.load %arg6[%c0_67, %c0_68, %c352] : memref<1x8x1024xf32, #tpu.memory_space<vmem>>, vector<1x8x32xf32>
    %164 = vector.shape_cast %163 : vector<1x8x32xf32> to vector<8x32xf32>
    %165 = vector.shape_cast %162 : vector<8x32xf32> to vector<1x8x32xf32>
    tpu.vector_store %arg6[%c0_67, %c0_68, %c352], %165 {strides = array<i32>} : memref<1x8x1024xf32, #tpu.memory_space<vmem>>, vector<1x8x32xf32>,
    %166 = vector.extract_strided_slice %141 {offsets = [0, 192], sizes = [8, 32], strides = [1, 1]} : vector<8x512xf32> to vector<8x32xf32>
    %c0_69 = arith.constant 0 : index
    %c0_70 = arith.constant 0 : index
    %c416 = arith.constant 416 : index
    %167 = vector.load %arg6[%c0_69, %c0_70, %c416] : memref<1x8x1024xf32, #tpu.memory_space<vmem>>, vector<1x8x32xf32>
    %168 = vector.shape_cast %167 : vector<1x8x32xf32> to vector<8x32xf32>
    %169 = vector.shape_cast %166 : vector<8x32xf32> to vector<1x8x32xf32>
    tpu.vector_store %arg6[%c0_69, %c0_70, %c416], %169 {strides = array<i32>} : memref<1x8x1024xf32, #tpu.memory_space<vmem>>, vector<1x8x32xf32>,
    %170 = vector.extract_strided_slice %141 {offsets = [0, 224], sizes = [8, 32], strides = [1, 1]} : vector<8x512xf32> to vector<8x32xf32>
    %c0_71 = arith.constant 0 : index
    %c0_72 = arith.constant 0 : index
    %c480 = arith.constant 480 : index
    %171 = vector.load %arg6[%c0_71, %c0_72, %c480] : memref<1x8x1024xf32, #tpu.memory_space<vmem>>, vector<1x8x32xf32>
    %172 = vector.shape_cast %171 : vector<1x8x32xf32> to vector<8x32xf32>
    %173 = vector.shape_cast %170 : vector<8x32xf32> to vector<1x8x32xf32>
    tpu.vector_store %arg6[%c0_71, %c0_72, %c480], %173 {strides = array<i32>} : memref<1x8x1024xf32, #tpu.memory_space<vmem>>, vector<1x8x32xf32>,
    %174 = vector.extract_strided_slice %141 {offsets = [0, 256], sizes = [8, 32], strides = [1, 1]} : vector<8x512xf32> to vector<8x32xf32>
    %c0_73 = arith.constant 0 : index
    %c0_74 = arith.constant 0 : index
    %c544 = arith.constant 544 : index
    %175 = vector.load %arg6[%c0_73, %c0_74, %c544] : memref<1x8x1024xf32, #tpu.memory_space<vmem>>, vector<1x8x32xf32>
    %176 = vector.shape_cast %175 : vector<1x8x32xf32> to vector<8x32xf32>
    %177 = vector.shape_cast %174 : vector<8x32xf32> to vector<1x8x32xf32>
    tpu.vector_store %arg6[%c0_73, %c0_74, %c544], %177 {strides = array<i32>} : memref<1x8x1024xf32, #tpu.memory_space<vmem>>, vector<1x8x32xf32>,
    %178 = vector.extract_strided_slice %141 {offsets = [0, 288], sizes = [8, 32], strides = [1, 1]} : vector<8x512xf32> to vector<8x32xf32>
    %c0_75 = arith.constant 0 : index
    %c0_76 = arith.constant 0 : index
    %c608 = arith.constant 608 : index
    %179 = vector.load %arg6[%c0_75, %c0_76, %c608] : memref<1x8x1024xf32, #tpu.memory_space<vmem>>, vector<1x8x32xf32>
    %180 = vector.shape_cast %179 : vector<1x8x32xf32> to vector<8x32xf32>
    %181 = vector.shape_cast %178 : vector<8x32xf32> to vector<1x8x32xf32>
    tpu.vector_store %arg6[%c0_75, %c0_76, %c608], %181 {strides = array<i32>} : memref<1x8x1024xf32, #tpu.memory_space<vmem>>, vector<1x8x32xf32>,
    %182 = vector.extract_strided_slice %141 {offsets = [0, 320], sizes = [8, 32], strides = [1, 1]} : vector<8x512xf32> to vector<8x32xf32>
    %c0_77 = arith.constant 0 : index
    %c0_78 = arith.constant 0 : index
    %c672 = arith.constant 672 : index
    %183 = vector.load %arg6[%c0_77, %c0_78, %c672] : memref<1x8x1024xf32, #tpu.memory_space<vmem>>, vector<1x8x32xf32>
    %184 = vector.shape_cast %183 : vector<1x8x32xf32> to vector<8x32xf32>
    %185 = vector.shape_cast %182 : vector<8x32xf32> to vector<1x8x32xf32>
    tpu.vector_store %arg6[%c0_77, %c0_78, %c672], %185 {strides = array<i32>} : memref<1x8x1024xf32, #tpu.memory_space<vmem>>, vector<1x8x32xf32>,
    %186 = vector.extract_strided_slice %141 {offsets = [0, 352], sizes = [8, 32], strides = [1, 1]} : vector<8x512xf32> to vector<8x32xf32>
    %c0_79 = arith.constant 0 : index
    %c0_80 = arith.constant 0 : index
    %c736 = arith.constant 736 : index
    %187 = vector.load %arg6[%c0_79, %c0_80, %c736] : memref<1x8x1024xf32, #tpu.memory_space<vmem>>, vector<1x8x32xf32>
    %188 = vector.shape_cast %187 : vector<1x8x32xf32> to vector<8x32xf32>
    %189 = vector.shape_cast %186 : vector<8x32xf32> to vector<1x8x32xf32>
    tpu.vector_store %arg6[%c0_79, %c0_80, %c736], %189 {strides = array<i32>} : memref<1x8x1024xf32, #tpu.memory_space<vmem>>, vector<1x8x32xf32>,
    %190 = vector.extract_strided_slice %141 {offsets = [0, 384], sizes = [8, 32], strides = [1, 1]} : vector<8x512xf32> to vector<8x32xf32>
    %c0_81 = arith.constant 0 : index
    %c0_82 = arith.constant 0 : index
    %c800 = arith.constant 800 : index
    %191 = vector.load %arg6[%c0_81, %c0_82, %c800] : memref<1x8x1024xf32, #tpu.memory_space<vmem>>, vector<1x8x32xf32>
    %192 = vector.shape_cast %191 : vector<1x8x32xf32> to vector<8x32xf32>
    %193 = vector.shape_cast %190 : vector<8x32xf32> to vector<1x8x32xf32>
    tpu.vector_store %arg6[%c0_81, %c0_82, %c800], %193 {strides = array<i32>} : memref<1x8x1024xf32, #tpu.memory_space<vmem>>, vector<1x8x32xf32>,
    %194 = vector.extract_strided_slice %141 {offsets = [0, 416], sizes = [8, 32], strides = [1, 1]} : vector<8x512xf32> to vector<8x32xf32>
    %c0_83 = arith.constant 0 : index
    %c0_84 = arith.constant 0 : index
    %c864 = arith.constant 864 : index
    %195 = vector.load %arg6[%c0_83, %c0_84, %c864] : memref<1x8x1024xf32, #tpu.memory_space<vmem>>, vector<1x8x32xf32>
    %196 = vector.shape_cast %195 : vector<1x8x32xf32> to vector<8x32xf32>
    %197 = vector.shape_cast %194 : vector<8x32xf32> to vector<1x8x32xf32>
    tpu.vector_store %arg6[%c0_83, %c0_84, %c864], %197 {strides = array<i32>} : memref<1x8x1024xf32, #tpu.memory_space<vmem>>, vector<1x8x32xf32>,
    %198 = vector.extract_strided_slice %141 {offsets = [0, 448], sizes = [8, 32], strides = [1, 1]} : vector<8x512xf32> to vector<8x32xf32>
    %c0_85 = arith.constant 0 : index
    %c0_86 = arith.constant 0 : index
    %c928 = arith.constant 928 : index
    %199 = vector.load %arg6[%c0_85, %c0_86, %c928] : memref<1x8x1024xf32, #tpu.memory_space<vmem>>, vector<1x8x32xf32>
    %200 = vector.shape_cast %199 : vector<1x8x32xf32> to vector<8x32xf32>
    %201 = vector.shape_cast %198 : vector<8x32xf32> to vector<1x8x32xf32>
    tpu.vector_store %arg6[%c0_85, %c0_86, %c928], %201 {strides = array<i32>} : memref<1x8x1024xf32, #tpu.memory_space<vmem>>, vector<1x8x32xf32>,
    %202 = vector.extract_strided_slice %141 {offsets = [0, 480], sizes = [8, 32], strides = [1, 1]} : vector<8x512xf32> to vector<8x32xf32>
    %c0_87 = arith.constant 0 : index
    %c0_88 = arith.constant 0 : index
    %c992 = arith.constant 992 : index
    %203 = vector.load %arg6[%c0_87, %c0_88, %c992] : memref<1x8x1024xf32, #tpu.memory_space<vmem>>, vector<1x8x32xf32>
    %204 = vector.shape_cast %203 : vector<1x8x32xf32> to vector<8x32xf32>
    %205 = vector.shape_cast %202 : vector<8x32xf32> to vector<1x8x32xf32>
    tpu.vector_store %arg6[%c0_87, %c0_88, %c992], %205 {strides = array<i32>} : memref<1x8x1024xf32, #tpu.memory_space<vmem>>, vector<1x8x32xf32>,
    return
  }
  func.func @transform_0(%arg0: i32, %arg1: i32) -> (i32, i32, i32) {
    %c0_i32 = arith.constant 0 : i32
    %c0_i32_0 = arith.constant 0 : i32
    return %arg0, %c0_i32, %arg1 : i32, i32, i32
  }
  func.func @transform_1(%arg0: i32, %arg1: i32) -> (i32, i32, i32, i32) {
    %c0_i32 = arith.constant 0 : i32
    %c0_i32_0 = arith.constant 0 : i32
    %c0_i32_1 = arith.constant 0 : i32
    return %arg0, %arg1, %c0_i32, %c0_i32_0 : i32, i32, i32, i32
  }
  func.func @transform_2(%arg0: i32, %arg1: i32) -> (i32, i32) {
    %c0_i32 = arith.constant 0 : i32
    %c0_i32_0 = arith.constant 0 : i32
    %c0_i32_1 = arith.constant 0 : i32
    return %c0_i32, %c0_i32_0 : i32, i32
  }
  func.func @transform_3(%arg0: i32, %arg1: i32) -> (i32, i32) {
    %c0_i32 = arith.constant 0 : i32
    %c0_i32_0 = arith.constant 0 : i32
    %c0_i32_1 = arith.constant 0 : i32
    return %c0_i32, %c0_i32_0 : i32, i32
  }
  func.func @transform_4(%arg0: i32, %arg1: i32) -> (i32, i32, i32) {
    %c0_i32 = arith.constant 0 : i32
    %c0_i32_0 = arith.constant 0 : i32
    return %arg0, %c0_i32, %arg1 : i32, i32, i32
  }
}

</mosaic_0001>

<bundles_post_ra>
// kernel: tile.8
= control target key start
LH: loop header
LB: loop body
LE: loop exit
PB: predicated region body
PF: predicated region fallthrough
CT: control target
= control target key end

     0   :  { %s22_s0 = inlined_call_operand.vmem [shape: f32[8], index: 0, kind: input, shape index: {}]   ;;  %s23_s1 = inlined_call_operand.vmem [shape: f32[4,8], index: 1, kind: output, shape index: {}]  }
   0x1   :  { %v4_v0 = vld [vmem:[%s22_s0] ss:$0 sm:$0xff] }
   0x2   :  { %5 = vst [vmem:[%s23_s1] sm:$0xf] %v4_v0 }

// kernel: mul.13
= control target key start
LH: loop header
LB: loop body
LE: loop exit
PB: predicated region body
PF: predicated region fallthrough
CT: control target
= control target key end

     0   :  { %vm7_vm0 = vcmask 64512   ;;  %s37_s8 = smov 8   ;;  %s38_s9 = smov 16   ;;  %vm13_vm1 = vcmask 261312   ;;  %vm19_vm2 = vcmask 195712   ;;  %vm25_vm3 = vcmask 130112   ;;  %s55_s0 = inlined_call_operand.vmem [shape: f32[4,8], index: 0, kind: input, shape index: {}]   ;;  %s56_s1 = inlined_call_operand.vmem [shape: f32[32], index: 1, kind: output, shape index: {}]  }
   0x1   :  { %v4_v0 = vld [vmem:[%s55_s0] sm:$0xf]  ;;  %s36_s0 = smov 24  }
   0x2   :  { %5 = vst [vmem:[#allocation1] sm:$0xf] %v4_v0 }
   0x9   :  { %v10_v1 = vld [vmem:[#allocation1 + $0x3] sm:$0x1]   ;;  %v22_v2 = vld [vmem:[#allocation1 + $0x1] sm:$0x1]   ;;  %v6_v3 = vld [vmem:[#allocation1] sm:$0x1]  }
   0xa   :  { %11 = vrot.lane.b32.xlu0 %v10_v1, %s36_s0  ;;  %23 = vrot.lane.b32.xlu1 %v22_v2, %s37_s8  ;;  %v16_v4 = vld [vmem:[#allocation1 + $0x2] sm:$0x1]   ;;  %8 = vst.msk [vmem:[#allocation0] sm:$0x1] %vm7_vm0, %v6_v3  }
   0xe   :  { %17 = vrot.lane.b32.xlu0 %v16_v4, %s38_s9 }
  0x7c   :  { %v12_v5 = vpop.permute.xlu0 %11   ;;  %v24_v6 = vpop.permute.xlu1 %23  }
  0x7d   :  { %14 = vst.msk [vmem:[#allocation0] sm:$0x1] %vm13_vm1, %v12_v5  }
  0x80   :  { %v18_v7 = vpop.permute.xlu0 %17  }
  0x81   :  { %20 = vst.msk [vmem:[#allocation0] sm:$0x1] %vm19_vm2, %v18_v7  }
  0x82   :  { %26 = vst.msk [vmem:[#allocation0] sm:$0x1] %vm25_vm3, %v24_v6  }
  0x89   :  { %v30_v8 = vld [vmem:[#allocation0] sm:$0x1] }
  0x8a   :  { %32 = vst [vmem:[%s56_s1] sm:$0x1] %v30_v8 }

// kernel: deconv_bn_relu.1
= control target key start
LH: loop header
LB: loop body
LE: loop exit
PB: predicated region body
PF: predicated region fallthrough
CT: control target
= control target key end

     0   :  { %s1087_s15 = smov 0   ;;  %s1089_s16 = smov 0   ;;  %s1361_s0 = inlined_call_operand.vmem [shape: f32[2,4,512], index: 0, kind: input, shape index: {}]   ;;  %s1362_s1 = inlined_call_operand.vmem [shape: f32[2,1,4,32], index: 1, kind: input, shape index: {}]   ;;  %s1363_s2 = inlined_call_operand.vmem [shape: f32[32,16], index: 2, kind: input, shape index: {}]   ;;  %s1364_s3 = inlined_call_operand.vmem [shape: f32[8,1], index: 3, kind: input, shape index: {}]   ;;  %s1365_s4 = inlined_call_operand.vmem [shape: f32[2,8,1024], index: 4, kind: output, shape index: {}]  }
   0x1   :  { %s1091_s17 = smov 0  }
   0x2 LB: > { %s26_s18 = sadd.s32 1, %s1050_s16  ;;  %p942_p0 = scmp.ge.s32.totalorder %s1054_s17, 1  ;;  %s1054_s17 = sphi %s1091_s17, %s14_s17   ;;  %s1050_s16 = sphi %s1089_s16, %s1373_s16   ;;  %s1046_s15 = sphi %s1087_s15, %s1372_s15  }
   0x3   : > { %p28_p1 = scmp.ge.s32.totalorder %s26_s18, 2  ;;  %p197_p2 = scmp.lt.s32.totalorder %s1054_s17, 3 }
   0x5   : > { %s1375_s18 = smov (%p28_p1, %s26_s18), 0  ;;  %p198_p3 = pnand %p942_p0, %p197_p2 }
   0x6   : > { %p239_p4 = scmp.lt.s32.totalorder (!%p198_p3), %s1046_s15, 1  ;;  %s1056_s24 = smov (!%p198_p3), 96   ;;  %vm418_vm0 = vcmask (!%p198_p3), 785408   ;;  %v1058_v21 = vmov (!%p198_p3), 0.0   ;;  %v682_v22 = vld [vmem:[%s1364_s3] sm:$0xff] (!%p198_p3)  ;;  %v1059_v23 = vmov (!%p198_p3), 0   ;;  %v268_v24 = vlaneseq (!%p198_p3) }
   0x7   : > { %201 = sbr.rel (%p198_p3) target bundleno = 655 (0x28f), region = 36  ;;  %s1057_s28 = smov (!%p198_p3), 126   ;;  %568 = vmatprep.mubr.f32.mxu0 (!%p198_p3), %v1058_v21  ;;  %657 = vmatprep.mubr.f32.mxu1 (!%p198_p3), %v1058_v21  ;;  %vm389_vm1 = vcmask (!%p198_p3), 1031168   ;;  %vm478_vm5 = vcmask (!%p198_p3), 1043456   ;;  %vm491_vm7 = vcmask (!%p198_p3), 130048   ;;  %vm708_vm12 = vcmask (!%p198_p3), 261120  }
   0x8   : > { %1028 = vset.pattern.permute.xlu1 (!%p198_p3), %v1059_v23  ;;  %1029 = vset.pattern.permute.xlu0 (!%p198_p3), %v1059_v23  ;;  %v1153_v25 = vand.u32 (!%p198_p3), 127, %v268_v24  ;;  %s1061_s21 = smov (!%p198_p3), 32   ;;  %vm714_vm13 = vcmask (!%p198_p3), 785920   ;;  %vm782_vm14 = vcmask (!%p198_p3), 523520   ;;  %vm787_vm15 = vcmask (!%p198_p3), 1048320  }
   0xa   : > { %v1156_v26 = vadd.s32 (!%p198_p3), 128, %v1153_v25  ;;  %v1159_v28 = vadd.s32 (!%p198_p3), 384, %v1153_v25  ;;  %v1162_v29 = vadd.s32 (!%p198_p3), 256, %v1153_v25  ;;  %v277_v40 = vand.u32 (!%p198_p3), 31, %v1153_v25 }
   0xc   : > { %v284_v32 = vand.u32 (!%p198_p3), 31, %v1156_v26  ;;  %v298_v33 = vand.u32 (!%p198_p3), 31, %v1159_v28  ;;  %v291_v34 = vand.u32 (!%p198_p3), 31, %v1162_v29  ;;  %vm321_vm6 = vcmp.ge.s32.totalorder (!%p198_p3), %v277_v40, 30 }
   0xe   : > { %s1377_s15 = smov (!%p239_p4, %s1046_s15), 1  ;;  %vm1170_vm2 = vcmp.ge.s32.totalorder %v284_v32, 30  ;;  %vm1176_vm3 = vcmp.ge.s32.totalorder %v298_v33, 30  ;;  %vm1183_vm4 = vcmp.ge.s32.totalorder %v291_v34, 30 }
   0xf   : > { %s958_s19 = sshll.u32 %s1377_s15, 4  ;;  %s945_s23 = sshll.u32 %s1377_s15, 2 }
  0x10   : > { %s246_s22 = scalar_lea.vmem %s1361_s0, %s958_s19  ;;  %s254_s27 = scalar_lea.vmem %s1362_s1, %s945_s23 }
  0x11   : > { %v1111_v0 = vld [vmem:[%s246_s22] sm:$0xff]  ;;  %v1113_v1 = vld [vmem:[%s246_s22 + $0x8] sm:$0xff]  ;;  %s959_s13 = sshll.u32 %s1377_s15, 6  ;;  %s1060_s15 = smov 64  }
  0x12   : > { %v1118_v2 = vcombine.high %v1111_v0, %v1111_v0  ;;  %410 = vrot.lane.b32.xlu1 %v1111_v0, %s1056_s24  ;;  %v1127_v3 = vcombine.high %v1113_v1, %v1113_v1  ;;  %v267_v4 = vld [vmem:[%s254_s27] sm:$0xf]  ;;  %s1265_s20 = scalar_lea.vmem %s1365_s4, %s959_s13 }
  0x14   : > { %v998_v5 = vpack.i.bf16 %v1113_v1, %v1118_v2  ;;  %v1003_v6 = vpack.i.bf16 %v267_v4, %v1127_v3 }
  0x16   : > { %999 = vrot.lane.b32.xlu0 %v998_v5, %s1056_s24  ;;  %1009 = vrot.lane.b32.xlu1 %v998_v5, %s1057_s28 }
  0x1a   : > { %1004 = vrot.lane.b32.xlu0 %v1003_v6, %s1056_s24 }
  0x84   : > { %v411_v10 = vpop.permute.xlu1 %410 }
  0x88   : > { %v1000_v7 = vpop.permute.xlu0 %999  ;;  %v1010_v27 = vpop.permute.xlu1 %1009 }
  0x89   : > { %v1002_v8 = vunpack.i.h.bf16 %v1000_v7  ;;  %v1001_v9 = vunpack.i.l.bf16 %v1000_v7  ;;  %v1012_v30 = vunpack.i.h.bf16 %v1010_v27  ;;  %v1011_v31 = vunpack.i.l.bf16 %v1010_v27 }
  0x8b   : > { %v1134_v11 = vsel %vm418_vm0, %v1001_v9, %v1002_v8  ;;  %v1138_v14 = vsel %vm418_vm0, %v411_v10, %v1001_v9  ;;  %v391_v35 = vsel %vm389_vm1, %v1011_v31, %v1012_v30 }
  0x8c   : > { %v1005_v12 = vpop.permute.xlu0 %1004  ;;  %v1013_v13 = vpack.i.bf16 %v1134_v11, %v1127_v3  ;;  %v1023_v19 = vpack.i.bf16 %v1138_v14, %v1111_v0  ;;  %v407_v44 = vsel %vm1170_vm2, 0.0, %v391_v35 }
  0x8d   : > { %v1007_v15 = vunpack.i.h.bf16 %v1005_v12  ;;  %v1006_v16 = vunpack.i.l.bf16 %v1005_v12  ;;  %v459_v55 = vrot.slane %v407_v44, 4 }
  0x8e   : > { %1014 = vrot.lane.b32.xlu0 %v1013_v13, %s1057_s28 }
  0x8f   : > { %v1140_v17 = vsel %vm418_vm0, %v1002_v8, %v1006_v16  ;;  %v1142_v18 = vsel %vm418_vm0, %v1006_v16, %v1007_v15  ;;  %v480_v8 = vsel %vm478_vm5, %v1118_v2, %v459_v55 }
  0x90   : > { %v1018_v20 = vpack.i.bf16 %v1142_v18, %v1140_v17 }
  0x92   : > { %1019 = vrot.lane.b32.xlu1 %v1018_v20, %s1057_s28  ;;  %1024 = vrot.lane.b32.xlu0 %v1023_v19, %s1057_s28 }
  0x96   : > { %697 = vperm.xlu1 %1028, %v682_v22  }
 0x100   : > { %v1015_v36 = vpop.permute.xlu0 %1014 }
 0x101   : > { %v1016_v39 = vunpack.i.l.bf16 %v1015_v36  ;;  %v1017_v45 = vunpack.i.h.bf16 %v1015_v36  ;;  %v350_v36 = vand.u32 1, %v298_v33 }
 0x103   : > { %v392_v42 = vsel %vm389_vm1, %v1012_v30, %v1016_v39  ;;  %v397_v43 = vsel %vm389_vm1, %v1016_v39, 0.0  ;;  %v343_v30 = vand.u32 1, %v291_v34  ;;  %vm376_vm11 = vcmp.eq.s32.totalorder %v350_v36, 0 }
 0x104   : > { %v409_v46 = vsel %vm1176_vm3, 0.0, %v397_v43  ;;  %v1020_v47 = vpop.permute.xlu1 %1019  ;;  %v1025_v48 = vpop.permute.xlu0 %1024  ;;  %v408_v52 = vsel %vm1183_vm4, 0.0, %v392_v42 }
 0x105   : > { %v1022_v49 = vunpack.i.h.bf16 %v1020_v47  ;;  %v1021_v50 = vunpack.i.l.bf16 %v1020_v47  ;;  %v1027_v51 = vunpack.i.h.bf16 %v1025_v48  ;;  %v461_v53 = vrot.slane %v409_v46, 4 }
 0x106   : > { %v1026_v54 = vunpack.i.l.bf16 %v1025_v48  ;;  %v460_v63 = vrot.slane %v408_v52, 4  ;;  %vm375_vm9 = vcmp.eq.s32.totalorder %v343_v30, 0 }
 0x107   : > { %v447_v56 = vsel %vm389_vm1, %v1022_v49, 0.0  ;;  %v441_v57 = vsel %vm389_vm1, %v1017_v45, %v1021_v50  ;;  %v442_v58 = vsel %vm389_vm1, %v1021_v50, %v1022_v49  ;;  %v440_v59 = vsel %vm389_vm1, %v1027_v51, %v1017_v45 }
 0x108   : > { %v451_v60 = vsel %vm1176_vm3, 0.0, %v447_v56  ;;  %v390_v61 = vsel %vm389_vm1, %v1026_v54, %v1011_v31  ;;  %v449_v62 = vsel %vm1170_vm2, 0.0, %v441_v57  ;;  %v448_v7 = vsel %vm321_vm6, 0.0, %v440_v59 }
 0x109   : > { %v473_v4 = vrot.slane %v451_v60, 4  ;;  %v471_v5 = vrot.slane %v449_v62, 4  ;;  %v406_v6 = vsel %vm321_vm6, 0.0, %v390_v61  ;;  %v470_v10 = vrot.slane %v448_v7, 4 }
 0x10a   : > { %v458_v9 = vrot.slane %v406_v6, 4  ;;  %v450_v12 = vsel %vm1183_vm4, 0.0, %v442_v58  ;;  %v482_v15 = vsel %vm478_vm5, %v1127_v3, %v461_v53  ;;  %v481_v27 = vsel %vm478_vm5, %v1113_v1, %v460_v63  ;;  %v489_v1 = vld [vmem:[%s1363_s2 + $0x10] sm:$0xff] }
 0x10b   : > { %v484_v13 = vsel %vm478_vm5, %v1134_v11, %v471_v5  ;;  %v486_v16 = vsel %vm478_vm5, %v1142_v18, %v473_v4  ;;  %v472_v19 = vrot.slane %v450_v12, 4  ;;  %v483_v23 = vsel %vm478_vm5, %v1138_v14, %v470_v10  ;;  %v487_v18 = vld [vmem:[%s1363_s2] sm:$0xff]  ;;  %v490_v14 = vld [vmem:[%s1363_s2 + $0x18] sm:$0xff] }
 0x10c   : > { %v960_v20 = vpack.c.bf16 %v484_v13, %v480_v8  ;;  %v964_v22 = vpack.c.bf16 %v486_v16, %v482_v15  ;;  %v479_v2 = vsel %vm478_vm5, %v1111_v0, %v458_v9  ;;  %v488_v0 = vld [vmem:[%s1363_s2 + $0x8] sm:$0xff]  ;;  %v336_v31 = vand.u32 1, %v284_v32 }
 0x10d   : > { %v962_v24 = vpack.c.bf16 %v483_v23, %v479_v2  ;;  %v485_v11 = vsel %vm478_vm5, %v1140_v17, %v472_v19  ;;  %v329_v17 = vand.u32 1, %v277_v40 }
 0x10e   : > { %961 = vmatprep.subr.bf16.mxu0 %v960_v20  ;;  %965 = vmatprep.subr.bf16.mxu1 %v964_v22  ;;  %v966_v3 = vpack.c.bf16 %v485_v11, %v481_v27  ;;  %vm374_vm10 = vcmp.eq.s32.totalorder %v336_v31, 0 }
 0x10f   : > { %963 = vmatpush1.bf16.msra.mxu0 %v962_v24  ;;  %vm373_vm8 = vcmp.eq.s32.totalorder %v329_v17, 0 }
 0x110   : > { %967 = vmatpush1.bf16.msra.mxu1 %v966_v3 }
 0x112   : > { %948 = vmatmul.mubr.msk.f32.vlgmr.msra.gmra.mrb[0].mxu0 %vm491_vm7, %v487_v18 }
 0x113   : > { %952 = vmatmul.mubr.msk.f32.vlgmr.msra.gmra.mrb[0].mxu1 %vm491_vm7, %v487_v18  ;;  %574 = vmatprep.mubr.f32.mxu0 %v1058_v21 }
 0x114   : > { %663 = vmatprep.mubr.f32.mxu1 %v1058_v21 }
 0x115   : > { %v698_v39 = vpop.permute.xlu1 %697 }
 0x116   : > { %949 = vmatmul.mubr.msk.f32.gmra.mrb[2].mxu0 %vm491_vm7, %v488_v0 }
 0x117   : > { %953 = vmatmul.mubr.msk.f32.gmra.mrb[2].mxu1 %vm491_vm7, %v488_v0  ;;  %580 = vmatprep.mubr.f32.mxu0 %v1058_v21 }
 0x118   : > { %669 = vmatprep.mubr.f32.mxu1 %v1058_v21 }
 0x11a   : > { %950 = vmatmul.mubr.msk.f32.gmra.mrb[4].mxu0 %vm491_vm7, %v489_v1 }
 0x11b   : > { %954 = vmatmul.mubr.msk.f32.gmra.mrb[4].mxu1 %vm491_vm7, %v489_v1  ;;  %586 = vmatprep.mubr.f32.mxu0 %v1058_v21 }
 0x11c   : > { %675 = vmatprep.mubr.f32.mxu1 %v1058_v21 }
 0x11e   : > { %951 = vmatmul.mubr.msk.f32.gmra.mrb[6].mxu0 %vm491_vm7, %v490_v14 }
 0x11f   : > { %955 = vmatmul.mubr.msk.f32.gmra.mrb[6].mxu1 %vm491_vm7, %v490_v14 }
 0x1e5   : > { %v570_v35 = vpop.f32.mrb[0].mxu0 }
 0x1e6   : > { %v572_v37 = vpop.f32.mrb[1].mxu0  ;;  %v659_v38 = vpop.f32.mrb[0].mxu1 }
 0x1e7   : > { %v661_v21 = vpop.f32.mrb[1].mxu1 }
 0x1e9   : > { %v576_v25 = vpop.f32.mrb[2].mxu0 }
 0x1ea   : > { %v691_v29 = vsel %vm373_vm8, %v570_v35, %v576_v25  ;;  %v665_v34 = vpop.f32.mrb[2].mxu1  ;;  %v578_v40 = vpop.f32.mrb[3].mxu0 }
 0x1eb   : > { %v693_v26 = vsel %vm375_vm9, %v659_v38, %v665_v34  ;;  %v692_v32 = vsel %vm374_vm10, %v572_v37, %v578_v40  ;;  %v667_v28 = vpop.f32.mrb[3].mxu1  ;;  %v700_v33 = vadd.f32 %v698_v39, %v691_v29 }
 0x1ec   : > { %v701_v41 = vadd.f32 %v698_v39, %v692_v32  ;;  %v694_v42 = vsel %vm376_vm11, %v661_v21, %v667_v28  ;;  %v702_v43 = vadd.f32 %v698_v39, %v693_v26 }
 0x1ed   : > { %v703_v44 = vadd.f32 %v698_v39, %v694_v42  ;;  %v704_v45 = vmax.f32 %v700_v33, 0.0  ;;  %v582_v46 = vpop.f32.mrb[4].mxu0 }
 0x1ee   : > { %v705_v47 = vmax.f32 %v701_v41, 0.0  ;;  %v671_v48 = vpop.f32.mrb[4].mxu1  ;;  %v584_v49 = vpop.f32.mrb[5].mxu0  ;;  %v706_v50 = vmax.f32 %v702_v43, 0.0 }
 0x1ef   : > { %v707_v51 = vmax.f32 %v703_v44, 0.0  ;;  %720 = vrot.lane.b32.xlu1 %v704_v45, %s1056_s24  ;;  %716 = vrot.lane.b32.xlu0 %v704_v45, %s1060_s15  ;;  %v673_v52 = vpop.f32.mrb[5].mxu1  ;;  %709 = vst.msk [vmem:[%s1265_s20] sm:$0xff] %vm708_vm12, %v704_v45 }
 0x1f0   : > { %724 = vst.msk [vmem:[%s1265_s20 + $0x10] sm:$0xff] %vm708_vm12, %v705_v47  ;;  %738 = vst.msk [vmem:[%s1265_s20 + $0x20] sm:$0xff] %vm708_vm12, %v706_v50 }
 0x1f1   : > { %v588_v53 = vpop.f32.mrb[6].mxu0  ;;  %752 = vst.msk [vmem:[%s1265_s20 + $0x30] sm:$0xff] %vm708_vm12, %v707_v51 }
 0x1f2   : > { %v766_v54 = vsel %vm373_vm8, %v582_v46, %v588_v53  ;;  %v677_v55 = vpop.f32.mrb[6].mxu1  ;;  %v590_v56 = vpop.f32.mrb[7].mxu0 }
 0x1f3   : > { %v768_v57 = vsel %vm375_vm9, %v671_v48, %v677_v55  ;;  %v767_v58 = vsel %vm374_vm10, %v584_v49, %v590_v56  ;;  %v679_v59 = vpop.f32.mrb[7].mxu1  ;;  %748 = vrot.lane.b32.xlu1 %v706_v50, %s1056_s24  ;;  %744 = vrot.lane.b32.xlu0 %v706_v50, %s1060_s15  ;;  %v770_v61 = vadd.f32 %v766_v54, %v698_v39 }
 0x1f4   : > { %v769_v60 = vsel %vm376_vm11, %v673_v52, %v679_v59  ;;  %v772_v63 = vadd.f32 %v768_v57, %v698_v39  ;;  %v771_v5 = vadd.f32 %v767_v58, %v698_v39 }
 0x1f5   : > { %v774_v62 = vmax.f32 %v770_v61, 0.0  ;;  %v773_v7 = vadd.f32 %v769_v60, %v698_v39 }
 0x1f6   : > { %v776_v4 = vmax.f32 %v772_v63, 0.0  ;;  %v775_v6 = vmax.f32 %v771_v5, 0.0 }
 0x1f7   : > { %711 = vrot.lane.b32.xlu0 %v704_v45, %s1061_s21  ;;  %730 = vrot.lane.b32.xlu1 %v705_v47, %s1060_s15  ;;  %v777_v8 = vmax.f32 %v773_v7, 0.0 }
 0x1fb   : > { %740 = vrot.lane.b32.xlu0 %v706_v50, %s1061_s21  ;;  %758 = vrot.lane.b32.xlu1 %v707_v51, %s1060_s15 }
 0x1ff   : > { %726 = vrot.lane.b32.xlu0 %v705_v47, %s1061_s21  ;;  %734 = vrot.lane.b32.xlu1 %v705_v47, %s1056_s24 }
 0x203   : > { %754 = vrot.lane.b32.xlu0 %v707_v51, %s1061_s21  ;;  %762 = vrot.lane.b32.xlu1 %v707_v51, %s1056_s24 }
 0x207   : > { %789 = vrot.lane.b32.xlu1 %v774_v62, %s1056_s24  ;;  %779 = vrot.lane.b32.xlu0 %v774_v62, %s1061_s21 }
 0x20b   : > { %817 = vrot.lane.b32.xlu1 %v776_v4, %s1056_s24  ;;  %809 = vrot.lane.b32.xlu0 %v776_v4, %s1061_s21 }
 0x20f   : > { %784 = vrot.lane.b32.xlu0 %v774_v62, %s1060_s15  ;;  %803 = vrot.lane.b32.xlu1 %v775_v6, %s1056_s24 }
 0x213   : > { %831 = vrot.lane.b32.xlu1 %v777_v8, %s1056_s24  ;;  %795 = vrot.lane.b32.xlu0 %v775_v6, %s1061_s21 }
 0x217   : > { %799 = vrot.lane.b32.xlu1 %v775_v6, %s1060_s15  ;;  %823 = vrot.lane.b32.xlu0 %v777_v8, %s1061_s21 }
 0x21b   : > { %827 = vrot.lane.b32.xlu1 %v777_v8, %s1060_s15  ;;  %813 = vrot.lane.b32.xlu0 %v776_v4, %s1060_s15 }
 0x261   : > { %v721_v9 = vpop.permute.xlu1 %720  ;;  %v717_v10 = vpop.permute.xlu0 %716 }
 0x262   : > { %719 = vst.msk [vmem:[%s1265_s20 + $0x8] sm:$0xff] %vm708_vm12, %v717_v10 }
 0x263   : > { %723 = vst.msk [vmem:[%s1265_s20 + $0x8] sm:$0xff] %vm714_vm13, %v721_v9 }
 0x265   : > { %v749_v12 = vpop.permute.xlu1 %748  ;;  %v745_v13 = vpop.permute.xlu0 %744 }
 0x266   : > { %747 = vst.msk [vmem:[%s1265_s20 + $0x28] sm:$0xff] %vm708_vm12, %v745_v13 }
 0x267   : > { %751 = vst.msk [vmem:[%s1265_s20 + $0x28] sm:$0xff] %vm714_vm13, %v749_v12 }
 0x269   : > { %v712_v15 = vpop.permute.xlu0 %711  ;;  %v731_v16 = vpop.permute.xlu1 %730 }
 0x26a   : > { %715 = vst.msk [vmem:[%s1265_s20] sm:$0xff] %vm714_vm13, %v712_v15 }
 0x26b   : > { %733 = vst.msk [vmem:[%s1265_s20 + $0x18] sm:$0xff] %vm708_vm12, %v731_v16 }
 0x26d   : > { %v741_v19 = vpop.permute.xlu0 %740  ;;  %v759_v20 = vpop.permute.xlu1 %758 }
 0x26e   : > { %743 = vst.msk [vmem:[%s1265_s20 + $0x20] sm:$0xff] %vm714_vm13, %v741_v19 }
 0x26f   : > { %761 = vst.msk [vmem:[%s1265_s20 + $0x38] sm:$0xff] %vm708_vm12, %v759_v20 }
 0x271   : > { %v727_v22 = vpop.permute.xlu0 %726  ;;  %v735_v2 = vpop.permute.xlu1 %734 }
 0x272   : > { %729 = vst.msk [vmem:[%s1265_s20 + $0x10] sm:$0xff] %vm714_vm13, %v727_v22  ;;  %737 = vst.msk [vmem:[%s1265_s20 + $0x18] sm:$0xff] %vm714_vm13, %v735_v2 }
 0x275   : > { %v755_v23 = vpop.permute.xlu0 %754  ;;  %v763_v24 = vpop.permute.xlu1 %762 }
 0x276   : > { %757 = vst.msk [vmem:[%s1265_s20 + $0x30] sm:$0xff] %vm714_vm13, %v755_v23  ;;  %765 = vst.msk [vmem:[%s1265_s20 + $0x38] sm:$0xff] %vm714_vm13, %v763_v24 }
 0x279   : > { %v790_v27 = vpop.permute.xlu1 %789  ;;  %v780_v11 = vpop.permute.xlu0 %779 }
 0x27a   : > { %792 = vst.msk [vmem:[%s1265_s20 + $0x8] sm:$0xff] %vm782_vm14, %v790_v27  ;;  %783 = vst.msk [vmem:[%s1265_s20] sm:$0xff] %vm782_vm14, %v780_v11 }
 0x27b   : > { %793 = vst.msk [vmem:[%s1265_s20 + $0x8] sm:$0xff] %vm787_vm15, %v774_v62 }
 0x27d   : > { %v818_v3 = vpop.permute.xlu1 %817  ;;  %v810_v18 = vpop.permute.xlu0 %809 }
 0x27e   : > { %820 = vst.msk [vmem:[%s1265_s20 + $0x28] sm:$0xff] %vm782_vm14, %v818_v3  ;;  %812 = vst.msk [vmem:[%s1265_s20 + $0x20] sm:$0xff] %vm782_vm14, %v810_v18 }
 0x27f   : > { %821 = vst.msk [vmem:[%s1265_s20 + $0x28] sm:$0xff] %vm787_vm15, %v776_v4 }
 0x281   : > { %v785_v0 = vpop.permute.xlu0 %784  ;;  %v804_v1 = vpop.permute.xlu1 %803 }
 0x282   : > { %788 = vst.msk [vmem:[%s1265_s20] sm:$0xff] %vm787_vm15, %v785_v0 }
 0x283   : > { %806 = vst.msk [vmem:[%s1265_s20 + $0x18] sm:$0xff] %vm782_vm14, %v804_v1 }
 0x284   : > { %807 = vst.msk [vmem:[%s1265_s20 + $0x18] sm:$0xff] %vm787_vm15, %v775_v6 }
 0x285   : > { %v832_v14 = vpop.permute.xlu1 %831  ;;  %v796_v17 = vpop.permute.xlu0 %795 }
 0x286   : > { %834 = vst.msk [vmem:[%s1265_s20 + $0x38] sm:$0xff] %vm782_vm14, %v832_v14  ;;  %798 = vst.msk [vmem:[%s1265_s20 + $0x10] sm:$0xff] %vm782_vm14, %v796_v17 }
 0x287   : > { %835 = vst.msk [vmem:[%s1265_s20 + $0x38] sm:$0xff] %vm787_vm15, %v777_v8 }
 0x289   : > { %v800_v30 = vpop.permute.xlu1 %799  ;;  %v824_v31 = vpop.permute.xlu0 %823 }
 0x28a   : > { %802 = vst.msk [vmem:[%s1265_s20 + $0x10] sm:$0xff] %vm787_vm15, %v800_v30 }
 0x28b   : > { %826 = vst.msk [vmem:[%s1265_s20 + $0x30] sm:$0xff] %vm782_vm14, %v824_v31 }
 0x28d   : > { %v828_v35 = vpop.permute.xlu1 %827  ;;  %v814_v36 = vpop.permute.xlu0 %813 }
 0x28e   : > { %830 = vst.msk [vmem:[%s1265_s20 + $0x30] sm:$0xff] %vm787_vm15, %v828_v35  ;;  %816 = vst.msk [vmem:[%s1265_s20 + $0x20] sm:$0xff] %vm787_vm15, %v814_v36 }
 0x28f PF: > { %s14_s17 = sadd.s32 1, %s1054_s17   ;;  %s1372_s15 = smov %s1050_s16 }
 0x290   : > { %p11_p5 = scmp.ge.s32.totalorder %s14_s17, 4   ;;  %s1373_s16 = smov %s1375_s18 }
 0x292   :  { %13 = sbr.rel (!%p11_p5) target bundleno = 2 (0x2), region = 69 }

</bundles_post_ra>
